<compile_context>
chip_gen: v5e
topology: v5e:2x2
jax: 0.10.0
libtpu: 0.0.40
codegen_flags: <defaults>
</compile_context>

<pallas_src>
import functools

import jax
import jax.numpy as jnp
from jax.experimental import pallas as pl
from jax.experimental.pallas import tpu as pltpu

_LANES = 128


def _sa_gen_loss_kernel(m_ref, p_ref, out_ref, *, alpha, beta, n_valid,
                        block_rows, steps_per_core):
    c = pl.program_id(0)            # "parallel" (core-split) axis
    i = pl.program_id(1)            # "arbitrary" (streaming reduction) axis

    @pl.when(i == 0)
    def _init():
        out_ref[...] = jnp.zeros_like(out_ref)

    m = m_ref[...].astype(jnp.float32)
    p = p_ref[...].astype(jnp.float32)

    # BCEWithLogits(x, y) = max(x, 0) - x*y + log1p(exp(-|x|))   (stable softplus form)
    map_term = jnp.maximum(-m, 0.0) + jnp.log1p(jnp.exp(-jnp.abs(m)))           # target = 1
    point_term = jnp.maximum(p, 0.0) + jnp.log1p(jnp.exp(-jnp.abs(p))) - p * m  # target = m

    contrib = alpha * map_term + beta * point_term

    # Mask the padded tail (padded zeros would otherwise add log(2) each).
    row0 = (c * steps_per_core + i) * block_rows
    rows = jax.lax.broadcasted_iota(jnp.int32, contrib.shape, 0) + row0
    cols = jax.lax.broadcasted_iota(jnp.int32, contrib.shape, 1)
    valid = (rows * _LANES + cols) < n_valid
    contrib = jnp.where(valid, contrib, 0.0)

    # Per-lane partial sums: sublane-only reduce + lane-dense unmasked accumulate.
    out_ref[...] += jnp.sum(contrib, axis=0, keepdims=True)


def sa_generator_loss(fake_mpred: jax.Array, fake_ppred: jax.Array,
                      alpha: float = 1.0, beta: float = 1.0,
                      *, block_rows: int = 1024) -> jax.Array:
    """Scalar float32 loss, matching the PyTorch SAGeneratorLoss forward exactly."""
    fake_mpred = jnp.asarray(fake_mpred)
    fake_ppred = jnp.asarray(fake_ppred)
    if fake_mpred.shape != fake_ppred.shape:
        raise ValueError("BCEWithLogitsLoss requires fake_ppred and its target "
                         "(fake_mpred) to have the same shape.")

    n = fake_mpred.size
    rows_needed = pl.cdiv(n, _LANES)
    # Block rows: big enough to hit HBM roofline, multiple of 16 (bf16-safe), but
    # never more than the (rounded-up) data so tiny inputs don't over-pad.
    block_rows = min(block_rows, pl.cdiv(rows_needed, 16) * 16)
    num_blocks = pl.cdiv(rows_needed, block_rows)
    num_cores = 2 if num_blocks >= 2 else 1      # v7x has 2 TCs; sequential elsewhere
    steps = pl.cdiv(num_blocks, num_cores)
    padded_rows = num_cores * steps * block_rows
    pad = padded_rows * _LANES - n

    def _prep(x):
        flat = x.reshape(-1)
        if pad:
            flat = jnp.pad(flat, (0, pad))
        return flat.reshape(padded_rows, _LANES)

    m2 = _prep(fake_mpred)
    p2 = _prep(fake_ppred)

    kernel = functools.partial(
        _sa_gen_loss_kernel,
        alpha=float(alpha), beta=float(beta), n_valid=n,
        block_rows=block_rows, steps_per_core=steps)

    partials = pl.pallas_call(
        kernel,
        out_shape=jax.ShapeDtypeStruct((1, num_cores * _LANES), jnp.float32),
        grid_spec=pltpu.PrefetchScalarGridSpec(
            num_scalar_prefetch=0,
            grid=(num_cores, steps),
            in_specs=[
                pl.BlockSpec((block_rows, _LANES), lambda c, i: (c * steps + i, 0)),
                pl.BlockSpec((block_rows, _LANES), lambda c, i: (c * steps + i, 0)),
            ],
            out_specs=pl.BlockSpec((1, _LANES), lambda c, i: (0, c)),
        ),
        compiler_params=pltpu.CompilerParams(
            dimension_semantics=("parallel", "arbitrary"),
        ),
    )(m2, p2)

    # Final reduce of the (1, num_cores*128) per-lane partials + fused mean scale:
    # a handful of XLA ops, negligible next to the streamed kernel.
    return jnp.sum(partials) / jnp.float32(n)


def _reference(fake_mpred, fake_ppred, alpha=1.0, beta=1.0):
    # Pure-JAX reference mirroring torch.nn.BCEWithLogitsLoss exactly.
    x = fake_mpred.astype(jnp.float32)
    p = fake_ppred.astype(jnp.float32)
    bce = lambda logits, tgt: (jnp.maximum(logits, 0.0) - logits * tgt
                               + jnp.log1p(jnp.exp(-jnp.abs(logits))))
    map_loss = jnp.mean(bce(x, jnp.ones_like(x)))
    point_loss = jnp.mean(bce(p, x))   # note: target is fake_mpred, as in the module
    return alpha * map_loss + beta * point_loss


if __name__ == "__main__":
    key = jax.random.PRNGKey(0)
    k1, k2 = jax.random.split(key)
    # PatchGAN-style logits for both heads: (N, C, H, W) = (2, 1, 16, 16)
    fake_mpred = jax.random.normal(k1, (2, 1, 16, 16), dtype=jnp.float32)
    fake_ppred = jax.random.normal(k2, (2, 1, 16, 16), dtype=jnp.float32)

    loss = sa_generator_loss(fake_mpred, fake_ppred, alpha=1.0, beta=1.0)
    jax.block_until_ready(loss)

    ref = _reference(fake_mpred, fake_ppred, 1.0, 1.0)
    assert jnp.allclose(loss, ref, atol=1e-5, rtol=1e-5), (loss, ref)

    print("KERNEL_OK")
</pallas_src>

<mosaic_0001>
module attributes {stable_mosaic.version = 11 : i64} {
  func.func @_sa_gen_loss_kernel(%arg0: i32, %arg1: i32, %arg2: memref<16x128xf32, #tpu.memory_space<vmem>>, %arg3: memref<16x128xf32, #tpu.memory_space<vmem>>, %arg4: memref<1x128xf32, #tpu.memory_space<vmem>>) attributes {dimension_semantics = [#tpu.dimension_semantics<parallel>, #tpu.dimension_semantics<arbitrary>], iteration_bounds = array<i64: 1, 1>, scalar_prefetch = 0 : i64, scratch_operands = 0 : i64, tpu.core_type = #tpu.core_type<tc>, window_params = [{transform_indices = @transform_0, window_bounds = array<i64: 16, 128>}, {transform_indices = @transform_1, window_bounds = array<i64: 16, 128>}, {transform_indices = @transform_2, window_bounds = array<i64: 1, 128>}]} {
    %c0_i32 = arith.constant 0 : i32
    %0 = arith.cmpi eq, %arg1, %c0_i32 : i32
    %1 = arith.extui %0 : i1 to i32
    %c0_i32_0 = arith.constant 0 : i32
    %2 = arith.cmpi ne, %1, %c0_i32_0 : i32
    scf.if %2 {
      %cst_16 = arith.constant 0.000000e+00 : f32
      %49 = vector.broadcast %cst_16 : f32 to vector<1x128xf32>
      %c0_17 = arith.constant 0 : index
      %c0_18 = arith.constant 0 : index
      %50 = vector.load %arg4[%c0_17, %c0_18] : memref<1x128xf32, #tpu.memory_space<vmem>>, vector<1x128xf32>
      tpu.vector_store %arg4[%c0_17, %c0_18], %49 {strides = array<i32>} : memref<1x128xf32, #tpu.memory_space<vmem>>, vector<1x128xf32>,
    } else {
    }
    %c0 = arith.constant 0 : index
    %c0_1 = arith.constant 0 : index
    %3 = vector.load %arg2[%c0, %c0_1] : memref<16x128xf32, #tpu.memory_space<vmem>>, vector<16x128xf32>
    %c0_2 = arith.constant 0 : index
    %c0_3 = arith.constant 0 : index
    %4 = vector.load %arg3[%c0_2, %c0_3] : memref<16x128xf32, #tpu.memory_space<vmem>>, vector<16x128xf32>
    %cst = arith.constant 0.000000e+00 : f32
    %5 = vector.broadcast %cst : f32 to vector<16x128xf32>
    %6 = arith.subf %5, %3 : vector<16x128xf32>
    %cst_4 = arith.constant 0.000000e+00 : f32
    %7 = vector.broadcast %cst_4 : f32 to vector<16x128xf32>
    %8 = arith.maximumf %6, %7 : vector<16x128xf32>
    %9 = math.absf %3 : vector<16x128xf32>
    %cst_5 = arith.constant 0.000000e+00 : f32
    %10 = vector.broadcast %cst_5 : f32 to vector<16x128xf32>
    %11 = arith.subf %10, %9 : vector<16x128xf32>
    %12 = math.exp %11 : vector<16x128xf32>
    %13 = math.log1p %12 : vector<16x128xf32>
    %14 = arith.addf %8, %13 : vector<16x128xf32>
    %cst_6 = arith.constant 0.000000e+00 : f32
    %15 = vector.broadcast %cst_6 : f32 to vector<16x128xf32>
    %16 = arith.maximumf %4, %15 : vector<16x128xf32>
    %17 = math.absf %4 : vector<16x128xf32>
    %cst_7 = arith.constant 0.000000e+00 : f32
    %18 = vector.broadcast %cst_7 : f32 to vector<16x128xf32>
    %19 = arith.subf %18, %17 : vector<16x128xf32>
    %20 = math.exp %19 : vector<16x128xf32>
    %21 = math.log1p %20 : vector<16x128xf32>
    %22 = arith.addf %16, %21 : vector<16x128xf32>
    %23 = arith.mulf %4, %3 : vector<16x128xf32>
    %24 = arith.subf %22, %23 : vector<16x128xf32>
    %cst_8 = arith.constant 1.000000e+00 : f32
    %25 = vector.broadcast %cst_8 : f32 to vector<16x128xf32>
    %26 = arith.mulf %25, %14 : vector<16x128xf32>
    %cst_9 = arith.constant 1.000000e+00 : f32
    %27 = vector.broadcast %cst_9 : f32 to vector<16x128xf32>
    %28 = arith.mulf %27, %24 : vector<16x128xf32>
    %29 = arith.addf %26, %28 : vector<16x128xf32>
    %c1_i32 = arith.constant 1 : i32
    %30 = arith.muli %arg0, %c1_i32 : i32
    %31 = arith.addi %30, %arg1 : i32
    %c16_i32 = arith.constant 16 : i32
    %32 = arith.muli %31, %c16_i32 : i32
    %33 = tpu.iota {dimensions = array<i32: 0>} : vector<16x128xi32>
    %34 = vector.broadcast %32 : i32 to vector<16x128xi32>
    %35 = arith.addi %33, %34 : vector<16x128xi32>
    %36 = tpu.iota {dimensions = array<i32: 1>} : vector<16x128xi32>
    %c128_i32 = arith.constant 128 : i32
    %37 = vector.broadcast %c128_i32 : i32 to vector<16x128xi32>
    %38 = arith.muli %35, %37 : vector<16x128xi32>
    %39 = arith.addi %38, %36 : vector<16x128xi32>
    %c512_i32 = arith.constant 512 : i32
    %40 = vector.broadcast %c512_i32 : i32 to vector<16x128xi32>
    %41 = arith.cmpi slt, %39, %40 : vector<16x128xi32>
    %cst_10 = arith.constant 0.000000e+00 : f32
    %42 = vector.broadcast %cst_10 : f32 to vector<16x128xf32>
    %43 = arith.select %41, %29, %42 : vector<16x128xi1>, vector<16x128xf32>
    %c0_11 = arith.constant 0 : index
    %c0_12 = arith.constant 0 : index
    %44 = vector.load %arg4[%c0_11, %c0_12] : memref<1x128xf32, #tpu.memory_space<vmem>>, vector<1x128xf32>
    %cst_13 = arith.constant dense<0.000000e+00> : vector<128xf32>
    %45 = vector.multi_reduction <add>, %43, %cst_13 [0] : vector<16x128xf32> to vector<128xf32>
    %46 = vector.shape_cast %45 : vector<128xf32> to vector<1x128xf32>
    %47 = arith.addf %44, %46 : vector<1x128xf32>
    %c0_14 = arith.constant 0 : index
    %c0_15 = arith.constant 0 : index
    %48 = vector.load %arg4[%c0_14, %c0_15] : memref<1x128xf32, #tpu.memory_space<vmem>>, vector<1x128xf32>
    tpu.vector_store %arg4[%c0_14, %c0_15], %47 {strides = array<i32>} : memref<1x128xf32, #tpu.memory_space<vmem>>, vector<1x128xf32>,
    return
  }
  func.func @transform_0(%arg0: i32, %arg1: i32) -> (i32, i32) {
    %c1_i32 = arith.constant 1 : i32
    %0 = arith.muli %arg0, %c1_i32 : i32
    %1 = arith.addi %0, %arg1 : i32
    %c0_i32 = arith.constant 0 : i32
    %c0_i32_0 = arith.constant 0 : i32
    return %1, %c0_i32 : i32, i32
  }
  func.func @transform_1(%arg0: i32, %arg1: i32) -> (i32, i32) {
    %c1_i32 = arith.constant 1 : i32
    %0 = arith.muli %arg0, %c1_i32 : i32
    %1 = arith.addi %0, %arg1 : i32
    %c0_i32 = arith.constant 0 : i32
    %c0_i32_0 = arith.constant 0 : i32
    return %1, %c0_i32 : i32, i32
  }
  func.func @transform_2(%arg0: i32, %arg1: i32) -> (i32, i32) {
    %c0_i32 = arith.constant 0 : i32
    %c0_i32_0 = arith.constant 0 : i32
    return %c0_i32, %arg0 : i32, i32
  }
}

</mosaic_0001>

<bundles_post_ra>
// kernel: tpu_custom_call.1
= control target key start
LH: loop header
LB: loop body
LE: loop exit
PB: predicated region body
PF: predicated region fallthrough
CT: control target
= control target key end

     0   :  { %7 = vsyncpa [#allocation3], 0  ;;  %s341_s0 = inlined_call_operand.hbm [shape: f32[16,128], index: 0, kind: input, shape index: {}]   ;;  %s342_s1 = inlined_call_operand.hbm [shape: f32[16,128], index: 1, kind: input, shape index: {}]   ;;  %s343_s2 = inlined_call_operand.hbm [shape: f32[1,128], index: 2, kind: output, shape index: {}]  }
   0x1   :  { %8 = vsyncpa [#allocation6], 0 }
   0x2   :  { %9 = vsyncpa [#allocation4], 0  ;;  %s18_s11 = sshll.u32 %s341_s0, 4  ;;  %s279_s12 = smov [#allocation2]   ;;  %s19_s11 = int_to_ptr.hbm [resolvable:$true] %s18_s11 }
   0x3   :  { %s20_s13 = sshll.u32 %s279_s12, 4  ;;  %s35_s16 = sshll.u32 %s342_s1, 4  ;;  %s21_s13 = int_to_ptr.vmem [resolvable:$true] %s20_s13  ;;  %s36_s16 = int_to_ptr.hbm [resolvable:$true] %s35_s16 }
   0x4   :  { %s280_s17 = smov 128   ;;  %s281_s18 = smov 8  }
   0x5   :  { %26 = dma.hbm_to_vmem [thread:$0]  %s19_s11, 256, %s21_s13, [#allocation3], %s280_s17, %s280_s17, %s281_s18  }
   0x6   :  { %s282_s19 = smov [#allocation5]  }
   0x7   :  { %s37_s20 = sshll.u32 %s282_s19, 4  ;;  %s38_s20 = int_to_ptr.vmem [resolvable:$true] %s37_s20 }
   0x8   :  { %43 = dma.hbm_to_vmem [thread:$0]  %s36_s16, 256, %s38_s20, [#allocation6], %s280_s17, %s280_s17, %s281_s18  }
   0x9   :  { %273 = dma.done.wait [#allocation3], 256  }
   0xa   :  { %274 = vsyncadd [#allocation3], 4294967040 }
   0xb   :  { %275 = dma.done.wait [#allocation6], 256  }
   0xc   :  { %276 = vsyncadd [#allocation6], 4294967040  ;;  %v283_v0 = vmov 0.0   ;;  %v306_v1 = vld [vmem:[#allocation2] sm:$0xff]  ;;  %v308_v2 = vld [vmem:[#allocation2 + $0x8] sm:$0xff]  ;;  %v135_v17 = vlaneseq  ;;  %s284_s0 = smov [#allocation7]  }
   0xd   :  { %60 = vst [vmem:[#allocation7] sm:$0x1] %v283_v0  ;;  %v310_v3 = vld [vmem:[#allocation5] sm:$0xff]  ;;  %v312_v4 = vld [vmem:[#allocation5 + $0x8] sm:$0xff]  ;;  %v69_v5 = vand.u32 2147483647, %v306_v1 }
   0xe   :  { %v70_v6 = vand.u32 2147483647, %v308_v2  ;;  %v99_v7 = vand.u32 2147483647, %v310_v3  ;;  %v100_v9 = vand.u32 2147483647, %v312_v4  ;;  %v127_v63 = vmul.f32 %v310_v3, %v306_v1 }
   0xf   :  { %v71_v8 = vsub.f32 0.0, %v69_v5  ;;  %v136_v27 = vshrl.u32 %v135_v17, 7  ;;  %v65_v32 = vsub.f32 0.0, %v306_v1  ;;  %v142_v41 = vand.u32 127, %v135_v17  ;;  %s166_s1 = sshll.u32 %s284_s0, 4  ;;  %s168_s23 = sshll.u32 %s343_s2, 4  ;;  %s167_s1 = int_to_ptr.vmem [resolvable:$true] %s166_s1  ;;  %s169_s23 = int_to_ptr.hbm [resolvable:$true] %s168_s23 }
  0x10   :  { %v72_v10 = vsub.f32 0.0, %v70_v6  ;;  %v101_v11 = vsub.f32 0.0, %v99_v7  ;;  %v102_v13 = vsub.f32 0.0, %v100_v9  ;;  %v66_v44 = vsub.f32 0.0, %v308_v2 }
  0x11   :  { %v73_v12 = vmul.f32 1.442695, %v71_v8  ;;  %v137_v38 = vadd.s32 8, %v136_v27  ;;  %v143_v42 = vmul.u32 128, %v136_v27  ;;  %v97_v46 = vmax.f32 %v310_v3, 0.0 }
  0x12   :  { %v75_v14 = vmul.f32 1.442695, %v72_v10  ;;  %v103_v15 = vmul.f32 1.442695, %v101_v11  ;;  %v105_v16 = vmul.f32 1.442695, %v102_v13  ;;  %v128_v10 = vmul.f32 %v312_v4, %v308_v2 }
  0x13   :  { %185 = vpow2.f32 %v73_v12  ;;  %v67_v49 = vmax.f32 %v65_v32, 0.0  ;;  %v144_v59 = vmul.u32 128, %v137_v38  ;;  %v68_v61 = vmax.f32 %v66_v44, 0.0 }
  0x14   :  { %187 = vpow2.f32 %v75_v14  ;;  %v98_v62 = vmax.f32 %v312_v4, 0.0  ;;  %v145_v7 = vadd.s32 %v143_v42, %v142_v41 }
  0x15   :  { %189 = vpow2.f32 %v103_v15  ;;  %v146_v12 = vadd.s32 %v144_v59, %v142_v41 }
  0x16   :  { %191 = vpow2.f32 %v105_v16  ;;  %vm147_vm4 = vcmp.lt.s32.totalorder %v145_v7, 512 }
  0x17   :  { %vm148_vm5 = vcmp.lt.s32.totalorder %v146_v12, 512 }
  0x19   :  { %v186_v18 = vpop.eup %185 }
  0x1a   :  { %v188_v19 = vpop.eup %187  ;;  %v77_v20 = vadd.f32 1.0, %v186_v18  ;;  %v80_v21 = vmul.f32 -0.5, %v186_v18  ;;  %v83_v30 = vand.u32 2147483647, %v186_v18 }
  0x1b   :  { %v190_v22 = vpop.eup %189  ;;  %v86_v23 = vadd.f32 1.0, %v188_v19  ;;  %v89_v24 = vmul.f32 -0.5, %v188_v19  ;;  %v92_v36 = vand.u32 2147483647, %v188_v19 }
  0x1c   :  { %v192_v25 = vpop.eup %191  ;;  %193 = vlog2.f32 %v77_v20  ;;  %v107_v26 = vadd.f32 1.0, %v190_v22  ;;  %v81_v28 = vadd.f32 1.0, %v80_v21  ;;  %v110_v29 = vmul.f32 -0.5, %v190_v22 }
  0x1d   :  { %195 = vlog2.f32 %v86_v23  ;;  %v116_v31 = vadd.f32 1.0, %v192_v25  ;;  %v90_v33 = vadd.f32 1.0, %v89_v24  ;;  %v119_v35 = vmul.f32 -0.5, %v192_v25 }
  0x1e   :  { %197 = vlog2.f32 %v107_v26  ;;  %v111_v34 = vadd.f32 1.0, %v110_v29  ;;  %v113_v37 = vand.u32 2147483647, %v190_v22  ;;  %v82_v39 = vmul.f32 %v186_v18, %v81_v28 }
  0x1f   :  { %199 = vlog2.f32 %v116_v31  ;;  %v120_v40 = vadd.f32 1.0, %v119_v35  ;;  %vm320_vm0 = vcmp.lt.f32.partialorder %v83_v30, 0.0004427343  ;;  %v122_v47 = vand.u32 2147483647, %v192_v25 }
  0x20   :  { %v91_v51 = vmul.f32 %v188_v19, %v90_v33  ;;  %v112_v52 = vmul.f32 %v190_v22, %v111_v34  ;;  %vm325_vm1 = vcmp.lt.f32.partialorder %v92_v36, 0.0004427343  ;;  %vm114_vm2 = vcmp.lt.f32.partialorder %v113_v37, 0.0004427343 }
  0x21   :  { %v121_v58 = vmul.f32 %v192_v25, %v120_v40  ;;  %vm123_vm3 = vcmp.lt.f32.partialorder %v122_v47, 0.0004427343  ;;  %v151_v25 = vld [vmem:[#allocation7] sm:$0x1] }
  0x22   :  { %v194_v43 = vpop.eup %193 }
  0x23   :  { %v196_v48 = vpop.eup %195  ;;  %v79_v50 = vmul.f32 0.6931472, %v194_v43 }
  0x24   :  { %v198_v53 = vpop.eup %197  ;;  %v88_v54 = vmul.f32 0.6931472, %v196_v48 }
  0x25   :  { %v85_v56 = vsel %vm320_vm0, %v82_v39, %v79_v50  ;;  %v109_v57 = vmul.f32 0.6931472, %v198_v53  ;;  %v200_v60 = vpop.eup %199 }
  0x26   :  { %v94_v0 = vsel %vm325_vm1, %v91_v51, %v88_v54  ;;  %v118_v6 = vmul.f32 0.6931472, %v200_v60  ;;  %v95_v8 = vadd.f32 %v85_v56, %v67_v49 }
  0x27   :  { %v115_v5 = vsel %vm114_vm2, %v112_v52, %v109_v57  ;;  %v96_v13 = vadd.f32 %v94_v0, %v68_v61 }
  0x28   :  { %v125_v9 = vadd.f32 %v115_v5, %v97_v46  ;;  %v124_v11 = vsel %vm123_vm3, %v121_v58, %v118_v6 }
  0x29   :  { %v126_v14 = vadd.f32 %v124_v11, %v98_v62 }
  0x2a   :  { %v129_v15 = vsub.f32 %v125_v9, %v127_v63 }
  0x2b   :  { %v130_v16 = vsub.f32 %v126_v14, %v128_v10 }
  0x2c   :  { %v131_v17 = vadd.f32 %v129_v15, %v95_v8 }
  0x2d   :  { %v132_v1 = vadd.f32 %v130_v16, %v96_v13 }
  0x2e   :  { %v149_v3 = vsel %vm147_vm4, %v131_v17, 0.0 }
  0x2f   :  { %v150_v18 = vsel %vm148_vm5, %v132_v1, 0.0 }
  0x30   :  { %v152_v19 = vadd.f32 %v150_v18, %v149_v3 }
  0x32   :  { %v153_v20 = vrot.slane %v152_v19, 4 }
  0x34   :  { %v154_v21 = vadd.f32 %v153_v20, %v152_v19 }
  0x36   :  { %v155_v22 = vrot.slane %v154_v21, 2 }
  0x38   :  { %v156_v23 = vadd.f32 %v155_v22, %v154_v21 }
  0x3a   :  { %v157_v24 = vrot.slane %v156_v23, 1 }
  0x3c   :  { %v158_v2 = vadd.f32 %v157_v24, %v156_v23 }
  0x3e   :  { %v159_v4 = vadd.f32 %v158_v2, %v151_v25 }
  0x40   :  { %160 = vst [vmem:[#allocation7] sm:$0x1] %v159_v4 }
  0x41   :  { %171 = dma.vmem_to_hbm [thread:$0]  %s167_s1, 16, %s169_s23, [#allocation4]  }
  0x42   :  { %277 = dma.done.wait [#allocation4], 16  }
  0x43   :  { %278 = vsyncadd [#allocation4], 4294967280 }
  0x44   :  { %176 = vsyncpa [#allocation3], 1 }
  0x45   :  { %177 = vsyncpa [#allocation6], 1 }
  0x46   :  { %178 = vsyncpa [#allocation4], 1 }

</bundles_post_ra>
